<compile_context>
chip_gen: v7x
topology: tpu7x:2x2x1
jax: 0.10.0
libtpu: 0.0.40
codegen_flags: <defaults>
</compile_context>

<pallas_src>
import jax
import jax.numpy as jnp
from jax.experimental import pallas as pl
from jax.experimental.pallas import tpu as pltpu

D_CAP, D_IMG = 768, 1536
D_FUSED = D_CAP + D_IMG          # 2304
D_HID, D_OUT = 512, 256
TK = 1152                        # fused-K tile (9 x 128) -> 2 grid steps


def head_kernel(x_ref, w_ref, b_ref, out_ref):
    k = pl.program_id(0)

    @pl.when(k == 0)
    def _():
        # Resident f32 output block starts from the folded bias.
        out_ref[...] = jnp.broadcast_to(b_ref[...], out_ref.shape)

    x_blk = x_ref[...].astype(jnp.bfloat16)            # [B, TK] bf16
    out_ref[...] += jnp.dot(x_blk, w_ref[...],         # bf16 x bf16 -> f32 acc
                            preferred_element_type=jnp.float32)


def fold_head_params(params):
    """One-time (offline) algebraic fold of the three Linear layers.

    Exact in f32 because the module has no nonlinearity between the layers:
      ((x @ [w1;w2]) + (b1+b2)) @ w3 + b3 == x @ ([w1;w2] @ w3) + ((b1+b2) @ w3 + b3)
    In deployment this runs once at model-load time, not per call.
    """
    w1, b1, w2, b2, w3, b3 = params
    w12 = jnp.concatenate([w1, w2], axis=0)                       # [2304, 512] f32
    w_fused = (w12 @ w3).astype(jnp.bfloat16)                     # [2304, 256] bf16
    b_final = ((b1 + b2) @ w3 + b3).astype(jnp.float32)           # [1, 256]   f32
    return w_fused, b_final


def bert_binary_classifier_head(emb_cap, emb_img, folded_params):
    """Pallas implementation of the BertBinaryClassifier classification head.

    emb_cap: [B, 768]   (BERT pooled output)
    emb_img: [B, 1536]  (image-net output)
    returns: [B, 256] float32
    """
    w_fused, b_final = folded_params
    B = emb_cap.shape[0]

    x = jnp.concatenate([emb_cap, emb_img], axis=-1)              # [B, 2304]

    assert D_FUSED % TK == 0
    nk = D_FUSED // TK

    grid_spec = pltpu.PrefetchScalarGridSpec(
        num_scalar_prefetch=0,
        grid=(nk,),
        in_specs=[
            pl.BlockSpec((B, TK), lambda k: (0, k)),              # activation K-tile
            pl.BlockSpec((TK, D_OUT), lambda k: (k, 0)),          # folded-weight K-tile
            pl.BlockSpec((1, D_OUT), lambda k: (0, 0)),           # bias, resident
        ],
        out_specs=pl.BlockSpec((B, D_OUT), lambda k: (0, 0)),     # output resident
    )

    return pl.pallas_call(
        head_kernel,
        out_shape=jax.ShapeDtypeStruct((B, D_OUT), jnp.float32),
        grid_spec=grid_spec,
        compiler_params=pltpu.CompilerParams(
            dimension_semantics=("arbitrary",),
            vmem_limit_bytes=16 << 20),
    )(x, w_fused, b_final)


def init_linear(key, in_f, out_f):
    """nn.Linear default init U(-1/sqrt(in), 1/sqrt(in)); weight stored [in, out]."""
    kw, kb = jax.random.split(key)
    bound = 1.0 / (in_f ** 0.5)
    w = jax.random.uniform(kw, (in_f, out_f), jnp.float32, -bound, bound)
    b = jax.random.uniform(kb, (1, out_f), jnp.float32, -bound, bound)
    return w, b


def reference_f32(emb_cap, emb_img, params):
    """Original module semantics in full f32."""
    w1, b1, w2, b2, w3, b3 = params
    h = (emb_cap @ w1 + b1) + (emb_img @ w2 + b2)
    return h @ w3 + b3


def reference_quantized(emb_cap, emb_img, params):
    """Mirror of the kernel arithmetic (folded bf16 weight, f32 accumulation)."""
    w1, b1, w2, b2, w3, b3 = params
    x = jnp.concatenate([emb_cap, emb_img], axis=-1).astype(jnp.bfloat16)
    w_fused = (jnp.concatenate([w1, w2], axis=0) @ w3).astype(jnp.bfloat16)
    b_final = (b1 + b2) @ w3 + b3
    return jnp.dot(x, w_fused, preferred_element_type=jnp.float32) + b_final


if __name__ == "__main__":
    key = jax.random.PRNGKey(0)
    k_cap, k_img, k1, k2, k3 = jax.random.split(key, 5)

    B = 8
    # Synthetic BERT pooled embedding and image-net embedding.
    emb_cap = jax.random.normal(k_cap, (B, D_CAP), jnp.float32)
    emb_img = jax.random.normal(k_img, (B, D_IMG), jnp.float32)

    w1, b1 = init_linear(k1, D_CAP, D_HID)     # linear_1
    w2, b2 = init_linear(k2, D_IMG, D_HID)     # linear_2
    w3, b3 = init_linear(k3, D_HID, D_OUT)     # linear
    params = (w1, b1, w2, b2, w3, b3)

    folded = fold_head_params(params)          # offline, once per model load
    out = bert_binary_classifier_head(emb_cap, emb_img, folded)
    out = jax.block_until_ready(out)
    assert out.shape == (B, D_OUT), out.shape

    # Tight check vs a reference that mirrors the kernel's bf16/f32 arithmetic.
    ref_q = reference_quantized(emb_cap, emb_img, params)
    assert jnp.allclose(out, ref_q, atol=1e-3, rtol=1e-3), \
        float(jnp.max(jnp.abs(out - ref_q)))

    # Loose check vs the full-precision module semantics (bf16 weight rounding).
    ref = reference_f32(emb_cap, emb_img, params)
    assert jnp.allclose(out, ref, atol=3e-2, rtol=3e-2), \
        float(jnp.max(jnp.abs(out - ref)))

    print("KERNEL_OK")
</pallas_src>

<mosaic_0001>
module attributes {stable_mosaic.version = 11 : i64} {
  func.func @head_kernel(%arg0: i32, %arg1: memref<8x1152xf32, #tpu.memory_space<vmem>>, %arg2: memref<1152x256xbf16, #tpu.memory_space<vmem>>, %arg3: memref<1x256xf32, #tpu.memory_space<vmem>>, %arg4: memref<8x256xf32, #tpu.memory_space<vmem>>) attributes {dimension_semantics = [#tpu.dimension_semantics<arbitrary>], iteration_bounds = array<i64: 2>, scalar_prefetch = 0 : i64, scratch_operands = 0 : i64, tpu.core_type = #tpu.core_type<tc>, window_params = [{transform_indices = @transform_0, window_bounds = array<i64: 8, 1152>}, {transform_indices = @transform_1, window_bounds = array<i64: 1152, 256>}, {pipeline_mode = #tpu.pipeline_mode<synchronous>, transform_indices = @transform_2, window_bounds = array<i64: 1, 256>}, {pipeline_mode = #tpu.pipeline_mode<synchronous>, transform_indices = @transform_3, window_bounds = array<i64: 8, 256>}]} {
    %c0_i32 = arith.constant 0 : i32
    %0 = arith.cmpi eq, %arg0, %c0_i32 : i32
    %1 = arith.extui %0 : i1 to i32
    %c0_i32_0 = arith.constant 0 : i32
    %2 = arith.cmpi ne, %1, %c0_i32_0 : i32
    scf.if %2 {
      %c0_8 = arith.constant 0 : index
      %c0_9 = arith.constant 0 : index
      %10 = vector.load %arg3[%c0_8, %c0_9] : memref<1x256xf32, #tpu.memory_space<vmem>>, vector<1x256xf32>
      %11 = vector.shape_cast %10 : vector<1x256xf32> to vector<1x256xf32>
      %12 = vector.broadcast %11 : vector<1x256xf32> to vector<8x256xf32>
      %c0_10 = arith.constant 0 : index
      %c0_11 = arith.constant 0 : index
      %13 = vector.load %arg4[%c0_10, %c0_11] : memref<8x256xf32, #tpu.memory_space<vmem>>, vector<8x256xf32>
      tpu.vector_store %arg4[%c0_10, %c0_11], %12 {strides = array<i32>} : memref<8x256xf32, #tpu.memory_space<vmem>>, vector<8x256xf32>,
    } else {
    }
    %c0 = arith.constant 0 : index
    %c0_1 = arith.constant 0 : index
    %3 = vector.load %arg1[%c0, %c0_1] : memref<8x1152xf32, #tpu.memory_space<vmem>>, vector<8x1152xf32>
    %4 = arith.truncf %3 : vector<8x1152xf32> to vector<8x1152xbf16>
    %c0_2 = arith.constant 0 : index
    %c0_3 = arith.constant 0 : index
    %5 = vector.load %arg4[%c0_2, %c0_3] : memref<8x256xf32, #tpu.memory_space<vmem>>, vector<8x256xf32>
    %c0_4 = arith.constant 0 : index
    %c0_5 = arith.constant 0 : index
    %6 = vector.load %arg2[%c0_4, %c0_5] : memref<1152x256xbf16, #tpu.memory_space<vmem>>, vector<1152x256xbf16>
    %cst = arith.constant dense<0.000000e+00> : vector<8x256xf32>
    %7 = tpu.matmul %4, %6, %cst {dimension_numbers = #tpu.dot_dimension_numbers<[1], [0], [0], [1], [0, 0, 1, 1], [], []>} : vector<8x1152xbf16>, vector<1152x256xbf16>, vector<8x256xf32> -> vector<8x256xf32>
    %8 = arith.addf %5, %7 : vector<8x256xf32>
    %c0_6 = arith.constant 0 : index
    %c0_7 = arith.constant 0 : index
    %9 = vector.load %arg4[%c0_6, %c0_7] : memref<8x256xf32, #tpu.memory_space<vmem>>, vector<8x256xf32>
    tpu.vector_store %arg4[%c0_6, %c0_7], %8 {strides = array<i32>} : memref<8x256xf32, #tpu.memory_space<vmem>>, vector<8x256xf32>,
    return
  }
  func.func @transform_0(%arg0: i32) -> (i32, i32) {
    %c0_i32 = arith.constant 0 : i32
    %c0_i32_0 = arith.constant 0 : i32
    return %c0_i32, %arg0 : i32, i32
  }
  func.func @transform_1(%arg0: i32) -> (i32, i32) {
    %c0_i32 = arith.constant 0 : i32
    %c0_i32_0 = arith.constant 0 : i32
    return %arg0, %c0_i32 : i32, i32
  }
  func.func @transform_2(%arg0: i32) -> (i32, i32) {
    %c0_i32 = arith.constant 0 : i32
    %c0_i32_0 = arith.constant 0 : i32
    %c0_i32_1 = arith.constant 0 : i32
    return %c0_i32, %c0_i32_0 : i32, i32
  }
  func.func @transform_3(%arg0: i32) -> (i32, i32) {
    %c0_i32 = arith.constant 0 : i32
    %c0_i32_0 = arith.constant 0 : i32
    %c0_i32_1 = arith.constant 0 : i32
    return %c0_i32, %c0_i32_0 : i32, i32
  }
}

</mosaic_0001>

<bundles_post_ra>
// kernel: tpu_custom_call.1
= control target key start
LH: loop header
LB: loop body
LE: loop exit
PB: predicated region body
PF: predicated region fallthrough
CT: control target
= control target key end

     0   :  { %8 = vsyncpa [#allocation3], 0  ;;  %s2434_s0 = inlined_call_operand.hbm [shape: f32[8,2304], index: 0, kind: input, shape index: {}]   ;;  %s2435_s1 = inlined_call_operand.hbm [shape: bf16[2304,256], index: 1, kind: input, shape index: {}]   ;;  %s2436_s2 = inlined_call_operand.hbm [shape: f32[1,256], index: 2, kind: input, shape index: {}]   ;;  %s2437_s3 = inlined_call_operand.hbm [shape: f32[8,256], index: 3, kind: output, shape index: {}]  }
   0x1   :  { %10 = vsyncpa [#allocation3 + $0x1], 0 }
   0x2   :  { %11 = vsyncpa [#allocation6], 0 }
   0x3   :  { %13 = vsyncpa [#allocation6 + $0x1], 0 }
   0x4   :  { %14 = vsyncpa [#allocation4], 0  ;;  %s2067_s12 = smov 0   ;;  %s2069_s13 = smov 0  }
   0x5   :  { %s2071_s14 = smov 0   ;;  %s2073_s15 = smov 0  }
   0x6 LB: > { %s2086_s16 = sadd.s32 4294967295, %s2038_s15   ;;  %s2089_s17 = sadd.s32 1, %s2038_s15   ;;  %s2038_s15 = sphi %s2073_s15, %s2455_s15   ;;  %s2034_s14 = sphi %s2071_s14, %s2454_s14   ;;  %s2030_s13 = sphi %s2069_s13, %s2453_s13   ;;  %s2026_s12 = sphi %s2067_s12, %s2452_s12  }
   0x7   : > { %s24_s18 = ssub.s32 %s2038_s15, %s2089_s17  ;;  %s27_s19 = sadd.s32 1, %s2034_s14 }
   0x8   : > { %p25_p0 = scmp.eq.s32.totalorder %s24_s18, 0  ;;  %p34_p1 = scmp.ne.s32.totalorder %s2034_s14, %s2030_s13 }
   0x9   : > { %p40_p2 = scmp.ne.s32.totalorder %s2030_s13, %s2026_s12  ;;  %p2438_p3 = scmp.eq.s32.totalorder %s2086_s16, 0 }
   0xa   : > { %s2099_s20 = scalar_select %p25_p0, %s2034_s14, %s27_s19  }
   0xb   : > { %p2103_p4 = por %p2438_p3, %p40_p2  ;;  %p1432_p5 = scmp.ge.s32.totalorder %s2038_s15, 1 }
   0xc   : > { %p119_p6 = scmp.lt.s32.totalorder %s2038_s15, 3  ;;  %s2040_s23 = smov [#allocation7]  }
   0xd   : > { %s2442_s21 = scalar_select %p2103_p4, 1, 0 }
   0xe   : > { %p2110_p8 = pnand %p1432_p5, %p119_p6  ;;  %s132_s24 = sshll.u32 %s2040_s23, 4  ;;  %s133_s24 = int_to_ptr.vmem [resolvable:$true] %s132_s24 }
   0xf   : > { %p35_p9 = scmp.eq.s32.totalorder %s2038_s15, 0  ;;  %p1621_p11 = scmp.lt.s32.totalorder %s2038_s15, 2 }
  0x10   : > { %s2443_s22 = scalar_select %p2110_p8, 1, 0 }
  0x11   : > { %p1609_p10 = pneg %p2110_p8  ;;  %p36_p12 = por %p35_p9, %p34_p1 }
  0x12   : > { %s2122_s25 = sand.u32 1, %s2034_s14   ;;  %s1589_s29 = smul.u32 1152, %s2038_s15 }
  0x13   : > { %p2126_p13 = pnand %p1609_p10, %p2438_p3  ;;  %s1593_s27 = smul.u32 72, %s2122_s25 }
  0x14   : > { %p2131_p0 = pnand %p1621_p11, %p36_p12  ;;  %s1878_s5 = scalar_lea.hbm %s2436_s2, 32 }
  0x15   : > { %p1879_p1 = scmp.ne.s32.totalorder %s2436_s2, %s1878_s5  ;;  %p1880_p2 = pneg %p2126_p13 }
  0x16   : > { %s2445_s28 = scalar_select %p2131_p0, 1, 0 }
  0x17   : > { %p1881_p5 = pnand %p1880_p2, %p1879_p1  ;;  %p1885_p9 = scmp.lt.u32.totalorder %s1878_s5, %s2436_s2 }
  0x19   : > { %p1882_p6 = pneg %p1881_p5 }
  0x1b   : > { %p1887_p10 = pnand %p1885_p9, %p1882_p6 }
  0x1d   : > { %1890 = shalt.err (!%p1887_p10)
}
  0x1e   : > { %s1891_s10 = scalar_lea.vmem %s133_s24, 32  ;;  %p1899_p3 = scmp.lt.s32.totalorder %s133_s24, %s133_s24 }
  0x1f   : > { %p1892_p11 = scmp.ne.s32.totalorder %s133_s24, %s1891_s10  ;;  %p1900_p4 = scmp.lt.s32.totalorder %s1891_s10, %s1891_s10 }
  0x21   : > { %p1894_p12 = pnand %p1892_p11, %p1880_p2  ;;  %p1901_p8 = por %p1900_p4, %p1899_p3 }
  0x23   : > { %p1895_p7 = pneg %p1894_p12 }
  0x25   : > { %p1902_p0 = pnand %p1901_p8, %p1895_p7 }
  0x27   : > { %1905 = shalt.err (!%p1902_p0)
}
  0x28   : > { %1612 = dma.hbm_to_vmem [thread:$0]  (!%p2126_p13), %s2436_s2, 32, %s133_s24, [#allocation6]  }
  0x29   : > { %s2155_s23 = scalar_lea.hbm %s2434_s0, %s1589_s29  ;;  %s147_s30 = scalar_lea.vmem [#allocation2], %s1593_s27 }
  0x2a   : > { %s155_s4 = sshll.u32 %s147_s30, 4  ;;  %s1594_s26 = smul.u32 1152, %s2122_s25  ;;  %s2157_s4 = int_to_ptr.vmem [resolvable:$true] %s155_s4 }
  0x2b   : > { %s144_s5 = scalar_lea.sflag [#allocation3], %s2122_s25  ;;  %s1906_s6 = scalar_lea.hbm %s2155_s23, 1152 }
  0x2c   : > { %p1907_p3 = scmp.ne.s32.totalorder %s2155_s23, %s1906_s6  ;;  %p2446_p4 = scmp.ne.s32.totalorder %s2445_s28, 0 }
  0x2d   : > { %s1911_s7 = scalar_lea.hbm %s2434_s0, 2304  ;;  %p1912_p0 = scmp.lt.u32.totalorder %s2155_s23, %s2434_s0 }
  0x2e   : > { %p1908_p7 = pneg %p2446_p4  ;;  %p1913_p1 = scmp.lt.u32.totalorder %s1911_s7, %s1906_s6 }
  0x2f   : > { %p1915_p5 = scmp.lt.u32.totalorder %s1906_s6, %s2155_s23 }
  0x30   : > { %p1909_p8 = pnand %p1908_p7, %p1907_p3  ;;  %p1914_p2 = por %p1913_p1, %p1912_p0 }
  0x32   : > { %p1910_p13 = pneg %p1909_p8  ;;  %p1916_p6 = por %p1915_p5, %p1914_p2 }
  0x34   : > { %p1917_p9 = pnand %p1916_p6, %p1910_p13 }
  0x36   : > { %1920 = shalt.err (!%p1917_p9)
}
  0x37   : > { %s1921_s27 = scalar_lea.vmem %s2157_s4, 1152  ;;  %s2041_s10 = smov [#allocation2]  }
  0x38   : > { %p1922_p10 = scmp.ne.s32.totalorder %s2157_s4, %s1921_s27  ;;  %s1926_s11 = sshll.u32 %s2041_s10, 4  ;;  %s1927_s11 = int_to_ptr.vmem [resolvable:$false] %s1926_s11 }
  0x39   : > { %s1928_s12 = scalar_lea.vmem %s1927_s11, 2304  ;;  %p1929_p3 = scmp.lt.s32.totalorder %s2157_s4, %s1927_s11 }
  0x3a   : > { %p1924_p11 = pnand %p1922_p10, %p1908_p7  ;;  %p1930_p8 = scmp.lt.s32.totalorder %s1928_s12, %s1921_s27 }
  0x3c   : > { %p1925_p12 = pneg %p1924_p11  ;;  %p1931_p0 = por %p1930_p8, %p1929_p3 }
  0x3e   : > { %p1932_p1 = pnand %p1931_p0, %p1925_p12 }
  0x40   : > { %1935 = shalt.err (!%p1932_p1)
}
  0x41   : > { %1616 = dma.hbm_to_vmem [thread:$0]  (!%p2446_p4), %s2155_s23, 1152, %s2157_s4, %s144_s5  }
  0x42   : > { %s162_s18 = sand.u32 1, %s2038_s15   ;;  %s166_s19 = scalar_lea.vmem [#allocation5], %s1594_s26 }
  0x43   : > { %s174_s30 = sshll.u32 %s166_s19, 4  ;;  %s1592_s6 = smul.u32 18432, %s2038_s15  ;;  %s2189_s30 = int_to_ptr.vmem [resolvable:$true] %s174_s30 }
  0x44   : > { %s2197_s8 = scalar_lea.sflag [#allocation6], %s162_s18  ;;  %s1941_s15 = scalar_lea.hbm %s2435_s1, 36864 }
  0x45   : > { %s2195_s7 = scalar_lea.hbm %s2435_s1, %s1592_s6 }
  0x46   : > { %s1936_s9 = scalar_lea.hbm %s2195_s7, 18432  ;;  %p1942_p6 = scmp.lt.u32.totalorder %s2195_s7, %s2435_s1 }
  0x47   : > { %p1937_p13 = scmp.ne.s32.totalorder %s2195_s7, %s1936_s9  ;;  %p1943_p9 = scmp.lt.u32.totalorder %s1941_s15, %s1936_s9 }
  0x48   : > { %p1945_p11 = scmp.lt.u32.totalorder %s1936_s9, %s2195_s7 }
  0x49   : > { %p1939_p2 = pnand %p1937_p13, %p1908_p7  ;;  %p1944_p10 = por %p1943_p9, %p1942_p6 }
  0x4b   : > { %p1940_p5 = pneg %p1939_p2  ;;  %p1946_p12 = por %p1945_p11, %p1944_p10 }
  0x4d   : > { %p1947_p3 = pnand %p1946_p12, %p1940_p5 }
  0x4f   : > { %1950 = shalt.err (!%p1947_p3)
}
  0x50   : > { %s1951_s5 = scalar_lea.vmem %s2189_s30, 18432  ;;  %s2042_s27 = smov [#allocation5]  }
  0x51   : > { %p1952_p8 = scmp.ne.s32.totalorder %s2189_s30, %s1951_s5  ;;  %s1956_s10 = sshll.u32 %s2042_s27, 4  ;;  %s1957_s10 = int_to_ptr.vmem [resolvable:$false] %s1956_s10 }
  0x52   : > { %s1958_s11 = scalar_lea.vmem %s1957_s10, 36864  ;;  %p1959_p13 = scmp.lt.s32.totalorder %s2189_s30, %s1957_s10 }
  0x53   : > { %p1954_p0 = pnand %p1952_p8, %p1908_p7  ;;  %p1960_p2 = scmp.lt.s32.totalorder %s1958_s11, %s1951_s5 }
  0x55   : > { %p1955_p1 = pneg %p1954_p0  ;;  %p1961_p6 = por %p1960_p2, %p1959_p13 }
  0x57   : > { %p1962_p9 = pnand %p1961_p6, %p1955_p1 }
  0x59   : > { %1965 = shalt.err (!%p1962_p9)
}
  0x5a   : > { %s2043_s12 = smov 128   ;;  %s2044_s18 = smov 8  }
  0x5b   : > { %1619 = dma.hbm_to_vmem [thread:$0]  (!%p2446_p4), %s2195_s7, 18432, %s2189_s30, %s2197_s8, %s2043_s12, %s2043_s12, %s2044_s18  }
  0x5c   : > { %p2447_p7 = scmp.ne.s32.totalorder %s2443_s22, 0 }
  0x5d   : > { %s188_s19 = sand.u32 (!%p2447_p7), 1, %s2030_s13   ;;  %p2448_p5 = scmp.ne.s32.totalorder (!%p2447_p7), %s2442_s21, 0 }
  0x5e   : > { %186 = sbr.rel (%p2447_p7) target bundleno = 512 (0x200), region = 32  ;;  %s189_s24 = scalar_lea.sflag (!%p2447_p7), [#allocation3], %s188_s19 }
  0x5f   : > { %s1595_s6 = smul.u32 (!%p2447_p7), 72, %s188_s19 }
  0x61   : > { %s2226_s29 = scalar_lea.vmem (!%p2447_p7), [#allocation2], %s1595_s6 }
  0x65   : > { %2009 = dma.done.wait (%p2448_p5), %s189_s24, 1152  }
  0x66   : > { %2011 = vsyncadd (%p2448_p5), %s189_s24, 4294966144  ;;  %s197_s9 = sand.u32 1, %s2086_s16   ;;  %s1596_s28 = smul.u32 1152, %s188_s19 }
  0x67   : > { %s198_s30 = scalar_lea.sflag [#allocation6], %s197_s9 }
  0x68   : > { %s2233_s7 = scalar_lea.vmem [#allocation5], %s1596_s28 }
  0x69   : > { %2013 = dma.done.wait (%p2448_p5), %s198_s30, 18432  }
  0x6a   : > { %2015 = vsyncadd (%p2448_p5), %s198_s30, 4294948864  ;;  %p2449_p4 = scmp.eq.s32.totalorder %s2086_s16, 0 }
  0x6c   : > { %2017 = dma.done.wait (%p2449_p4), [#allocation6], 32   ;;  %p2450_p10 = pmov %p2449_p4 }
  0x6d   : > { %p2451_p11 = scmp.ne.s32.totalorder %s2086_s16, 0 }
  0x6e   : > { %2019 = vsyncadd (%p2450_p10), [#allocation6], 4294967264  ;;  %v237_v0 = vlaneseq (!%p2451_p11)  ;;  %v235_v2 = vld [vmem:[#allocation7] sm:$0x3] (!%p2451_p11) }
  0x6f   : > { %234 = sbr.rel (%p2451_p11) target bundleno = 119 (0x77), region = 48 }
  0x70   : > { %v238_v1 = vshrl.u32 (!%p2451_p11), %v237_v0, 7 }
  0x72   : > { %v239_v3 = vsub.s32 (!%p2451_p11), 0, %v238_v1  ;;  %v243_v4 = vsub.s32 (!%p2451_p11), 1, %v238_v1 }
  0x74   : > { %v240_v5 = vrot.slane (!%p2451_p11), %v235_v2, %v239_v3  ;;  %v244_v6 = vrot.slane (!%p2451_p11), %v235_v2, %v243_v4 }
  0x76   : > { %247 = vst [vmem:[#allocation8] sm:$0xff] %v240_v5  ;;  %248 = vst [vmem:[#allocation8 + $0x8] sm:$0xff] %v244_v6 }
  0x77 PF: > { %v1662_v7 = vld [vmem:[%s2233_s7 + $0x4] ss:$8 sps:$4 sm:$0xff]   ;;  %v1666_v9 = vld [vmem:[%s2233_s7] ss:$8 sps:$4 sm:$0xff]   ;;  %v1668_v11 = vld [vmem:[%s2233_s7 + $0x14] ss:$8 sps:$4 sm:$0xff]  }
  0x78   : > { %v1664_v8 = vld [vmem:[%s2233_s7 + $0x104] ss:$8 sps:$4 sm:$0xff]   ;;  %1133 = vmatprep.subr.bf16.mxu0 %v1662_v7  ;;  %v1667_v10 = vld [vmem:[%s2233_s7 + $0x100] ss:$8 sps:$4 sm:$0xff]   ;;  %v1670_v12 = vld [vmem:[%s2233_s7 + $0x114] ss:$8 sps:$4 sm:$0xff]  }
  0x79   : > { %1174 = vmatprep.subr.bf16.mxu1 %v1664_v8  ;;  %1134 = vmatpush1.bf16.msra.mxu0 %v1666_v9  ;;  %v1672_v13 = vld [vmem:[%s2233_s7 + $0x10] ss:$8 sps:$4 sm:$0xff]   ;;  %v1674_v15 = vld [vmem:[%s2233_s7 + $0x24] ss:$8 sps:$4 sm:$0xff]   ;;  %v1678_v17 = vld [vmem:[%s2233_s7 + $0x20] ss:$8 sps:$4 sm:$0xff]  }
  0x7a   : > { %1175 = vmatpush1.bf16.msra.mxu1 %v1667_v10  ;;  %1135 = vmatprep.subr.bf16.mxu0 %v1668_v11  ;;  %v1673_v14 = vld [vmem:[%s2233_s7 + $0x110] ss:$8 sps:$4 sm:$0xff]   ;;  %v1676_v16 = vld [vmem:[%s2233_s7 + $0x124] ss:$8 sps:$4 sm:$0xff]   ;;  %v1679_v18 = vld [vmem:[%s2233_s7 + $0x120] ss:$8 sps:$4 sm:$0xff]  }
  0x7b   : > { %1176 = vmatprep.subr.bf16.mxu1 %v1670_v12  ;;  %v1680_v19 = vld [vmem:[%s2233_s7 + $0x34] ss:$8 sps:$4 sm:$0xff]   ;;  %v1684_v21 = vld [vmem:[%s2233_s7 + $0x30] ss:$8 sps:$4 sm:$0xff]   ;;  %v1686_v23 = vld [vmem:[%s2233_s7 + $0x44] ss:$8 sps:$4 sm:$0xff]  }
  0x7c   : > { %v1682_v20 = vld [vmem:[%s2233_s7 + $0x134] ss:$8 sps:$4 sm:$0xff]   ;;  %v1685_v22 = vld [vmem:[%s2233_s7 + $0x130] ss:$8 sps:$4 sm:$0xff]   ;;  %v1688_v24 = vld [vmem:[%s2233_s7 + $0x144] ss:$8 sps:$4 sm:$0xff]  }
  0x7d   : > { %1136 = vmatpush1.bf16.msra.mxu0 %v1672_v13  ;;  %v1690_v25 = vld [vmem:[%s2233_s7 + $0x40] ss:$8 sps:$4 sm:$0xff]   ;;  %v1692_v27 = vld [vmem:[%s2233_s7 + $0x54] ss:$8 sps:$4 sm:$0xff]   ;;  %v1696_v29 = vld [vmem:[%s2233_s7 + $0x50] ss:$8 sps:$4 sm:$0xff]  }
  0x7e   : > { %1177 = vmatpush1.bf16.msra.mxu1 %v1673_v14  ;;  %1137 = vmatprep.subr.bf16.mxu0 %v1674_v15  ;;  %v1691_v26 = vld [vmem:[%s2233_s7 + $0x140] ss:$8 sps:$4 sm:$0xff]   ;;  %v1694_v28 = vld [vmem:[%s2233_s7 + $0x154] ss:$8 sps:$4 sm:$0xff]   ;;  %v1697_v30 = vld [vmem:[%s2233_s7 + $0x150] ss:$8 sps:$4 sm:$0xff]  }
  0x7f   : > { %1178 = vmatprep.subr.bf16.mxu1 %v1676_v16  ;;  %v1698_v31 = vld [vmem:[%s2233_s7 + $0x64] ss:$8 sps:$4 sm:$0xff]   ;;  %v1702_v33 = vld [vmem:[%s2233_s7 + $0x60] ss:$8 sps:$4 sm:$0xff]   ;;  %v1704_v35 = vld [vmem:[%s2233_s7 + $0x74] ss:$8 sps:$4 sm:$0xff]  }
  0x80   : > { %v1700_v32 = vld [vmem:[%s2233_s7 + $0x164] ss:$8 sps:$4 sm:$0xff]   ;;  %v1703_v34 = vld [vmem:[%s2233_s7 + $0x160] ss:$8 sps:$4 sm:$0xff]   ;;  %v1706_v36 = vld [vmem:[%s2233_s7 + $0x174] ss:$8 sps:$4 sm:$0xff]  }
  0x81   : > { %1138 = vmatpush1.bf16.msra.mxu0 %v1678_v17  ;;  %v1708_v37 = vld [vmem:[%s2233_s7 + $0x70] ss:$8 sps:$4 sm:$0xff]   ;;  %v1710_v39 = vld [vmem:[%s2233_s7 + $0x84] ss:$8 sps:$4 sm:$0xff]   ;;  %v1714_v41 = vld [vmem:[%s2233_s7 + $0x80] ss:$8 sps:$4 sm:$0xff]  }
  0x82   : > { %1179 = vmatpush1.bf16.msra.mxu1 %v1679_v18  ;;  %1139 = vmatprep.subr.bf16.mxu0 %v1680_v19  ;;  %v1709_v38 = vld [vmem:[%s2233_s7 + $0x170] ss:$8 sps:$4 sm:$0xff]   ;;  %v1712_v40 = vld [vmem:[%s2233_s7 + $0x184] ss:$8 sps:$4 sm:$0xff]   ;;  %v1715_v42 = vld [vmem:[%s2233_s7 + $0x180] ss:$8 sps:$4 sm:$0xff]  }
  0x83   : > { %1180 = vmatprep.subr.bf16.mxu1 %v1682_v20  ;;  %v1716_v43 = vld [vmem:[%s2233_s7 + $0x94] ss:$8 sps:$4 sm:$0xff]   ;;  %v1720_v45 = vld [vmem:[%s2233_s7 + $0x90] ss:$8 sps:$4 sm:$0xff]   ;;  %v1722_v47 = vld [vmem:[%s2233_s7 + $0xa4] ss:$8 sps:$4 sm:$0xff]  }
  0x84   : > { %v1718_v44 = vld [vmem:[%s2233_s7 + $0x194] ss:$8 sps:$4 sm:$0xff]   ;;  %v1721_v46 = vld [vmem:[%s2233_s7 + $0x190] ss:$8 sps:$4 sm:$0xff]   ;;  %v1724_v48 = vld [vmem:[%s2233_s7 + $0x1a4] ss:$8 sps:$4 sm:$0xff]  }
  0x85   : > { %1140 = vmatpush1.bf16.msra.mxu0 %v1684_v21  ;;  %v1726_v49 = vld [vmem:[%s2233_s7 + $0xa0] ss:$8 sps:$4 sm:$0xff]   ;;  %v1728_v51 = vld [vmem:[%s2233_s7 + $0xb4] ss:$8 sps:$4 sm:$0xff]   ;;  %v1732_v54 = vld [vmem:[%s2233_s7 + $0xb0] ss:$8 sps:$4 sm:$0xff]  }
  0x86   : > { %1181 = vmatpush1.bf16.msra.mxu1 %v1685_v22  ;;  %1141 = vmatprep.subr.bf16.mxu0 %v1686_v23  ;;  %v1727_v50 = vld [vmem:[%s2233_s7 + $0x1a0] ss:$8 sps:$4 sm:$0xff]   ;;  %v1730_v52 = vld [vmem:[%s2233_s7 + $0x1b4] ss:$8 sps:$4 sm:$0xff]   ;;  %v1733_v55 = vld [vmem:[%s2233_s7 + $0x1b0] ss:$8 sps:$4 sm:$0xff]  }
  0x87   : > { %1182 = vmatprep.subr.bf16.mxu1 %v1688_v24  ;;  %v250_v53 = vld [vmem:[%s2226_s29 + $0x8] sm:$0xff]  ;;  %v252_v57 = vld [vmem:[%s2226_s29 + $0x18] sm:$0xff]  ;;  %v249_v11 = vld [vmem:[%s2226_s29] sm:$0xff]  ;;  %s2046_s21 = smov [#allocation8]   ;;  %p1623_p12 = scmp.eq.s32.totalorder %s2086_s16, 1 }
  0x88   : > { %v259_v56 = vpack.c.bf16 %v250_v53, %v250_v53  ;;  %v1734_v58 = vld [vmem:[%s2233_s7 + $0xc4] ss:$8 sps:$4 sm:$0xff]   ;;  %v261_v59 = vpack.c.bf16 %v252_v57, %v252_v57  ;;  %v1738_v61 = vld [vmem:[%s2233_s7 + $0xc0] ss:$8 sps:$4 sm:$0xff]   ;;  %v1740_v63 = vld [vmem:[%s2233_s7 + $0xd4] ss:$8 sps:$4 sm:$0xff]   ;;  %v258_v15 = vpack.c.bf16 %v249_v11, %v249_v11 }
  0x89   : > { %1142 = vmatpush1.bf16.msra.mxu0 %v1690_v25  ;;  %v1736_v60 = vld [vmem:[%s2233_s7 + $0x1c4] ss:$8 sps:$4 sm:$0xff]   ;;  %v1739_v62 = vld [vmem:[%s2233_s7 + $0x1c0] ss:$8 sps:$4 sm:$0xff]   ;;  %v1742_v0 = vld [vmem:[%s2233_s7 + $0x1d4] ss:$8 sps:$4 sm:$0xff]  }
  0x8a   : > { %1183 = vmatpush1.bf16.msra.mxu1 %v1691_v26  ;;  %1143 = vmatprep.subr.bf16.mxu0 %v1692_v27  ;;  %v1744_v1 = vld [vmem:[%s2233_s7 + $0xd0] ss:$8 sps:$4 sm:$0xff]   ;;  %v1746_v3 = vld [vmem:[%s2233_s7 + $0xe4] ss:$8 sps:$4 sm:$0xff]   ;;  %v1750_v5 = vld [vmem:[%s2233_s7 + $0xe0] ss:$8 sps:$4 sm:$0xff]  }
  0x8b   : > { %1184 = vmatprep.subr.bf16.mxu1 %v1694_v28  ;;  %1165 = vmatprep.mubr.bf16.mxu0 %v259_v56  ;;  %v1745_v2 = vld [vmem:[%s2233_s7 + $0x1d0] ss:$8 sps:$4 sm:$0xff]   ;;  %v1748_v4 = vld [vmem:[%s2233_s7 + $0x1e4] ss:$8 sps:$4 sm:$0xff]   ;;  %v1751_v6 = vld [vmem:[%s2233_s7 + $0x1e0] ss:$8 sps:$4 sm:$0xff]  }
  0x8c   : > { %1206 = vmatprep.mubr.bf16.mxu1 %v261_v59  ;;  %v1752_v7 = vld [vmem:[%s2233_s7 + $0xf4] ss:$8 sps:$4 sm:$0xff]   ;;  %v1756_v9 = vld [vmem:[%s2233_s7 + $0xf0] ss:$8 sps:$4 sm:$0xff]   ;;  %v251_v12 = vld [vmem:[%s2226_s29 + $0x10] sm:$0xff]  ;;  %s1349_s22 = sshll.u32 %s2046_s21, 4  ;;  %s1350_s22 = int_to_ptr.vmem [resolvable:$true] %s1349_s22 }
  0x8d   : > { %1144 = vmatpush1.bf16.msra.mxu0 %v1696_v29  ;;  %v1754_v8 = vld [vmem:[%s2233_s7 + $0x1f4] ss:$8 sps:$4 sm:$0xff]   ;;  %v1757_v10 = vld [vmem:[%s2233_s7 + $0x1f0] ss:$8 sps:$4 sm:$0xff]   ;;  %v1760_v13 = vld [vmem:[%s2233_s7 + $0x204] ss:$8 sps:$4 sm:$0xff]   ;;  %v260_v16 = vpack.c.bf16 %v251_v12, %v251_v12  ;;  %p1973_p1 = scmp.lt.s32.totalorder %s1350_s22, %s1350_s22 }
  0x8e   : > { %1185 = vmatpush1.bf16.msra.mxu1 %v1697_v30  ;;  %1145 = vmatprep.subr.bf16.mxu0 %v1698_v31  ;;  %v1763_v14 = vld [vmem:[%s2233_s7 + $0x304] ss:$8 sps:$4 sm:$0xff]   ;;  %v1758_v17 = vld [vmem:[%s2233_s7 + $0x200] ss:$8 sps:$4 sm:$0xff]   ;;  %v1766_v19 = vld [vmem:[%s2233_s7 + $0x214] ss:$8 sps:$4 sm:$0xff]  }
  0x8f   : > { %1186 = vmatprep.subr.bf16.mxu1 %v1700_v32  ;;  %v1761_v18 = vld [vmem:[%s2233_s7 + $0x300] ss:$8 sps:$4 sm:$0xff]   ;;  %v1769_v20 = vld [vmem:[%s2233_s7 + $0x314] ss:$8 sps:$4 sm:$0xff]   ;;  %v1764_v21 = vld [vmem:[%s2233_s7 + $0x210] ss:$8 sps:$4 sm:$0xff]  }
  0x90   : > { %v1767_v22 = vld [vmem:[%s2233_s7 + $0x310] ss:$8 sps:$4 sm:$0xff]   ;;  %v1772_v23 = vld [vmem:[%s2233_s7 + $0x224] ss:$8 sps:$4 sm:$0xff]   ;;  %v1770_v25 = vld [vmem:[%s2233_s7 + $0x220] ss:$8 sps:$4 sm:$0xff]  }
  0x91   : > { %1146 = vmatpush1.bf16.msra.mxu0 %v1702_v33  ;;  %v1775_v24 = vld [vmem:[%s2233_s7 + $0x324] ss:$8 sps:$4 sm:$0xff]   ;;  %v1773_v26 = vld [vmem:[%s2233_s7 + $0x320] ss:$8 sps:$4 sm:$0xff]   ;;  %v1778_v27 = vld [vmem:[%s2233_s7 + $0x234] ss:$8 sps:$4 sm:$0xff]  }
  0x92   : > { %1187 = vmatpush1.bf16.msra.mxu1 %v1703_v34  ;;  %1147 = vmatprep.subr.bf16.mxu0 %v1704_v35  ;;  %v1781_v28 = vld [vmem:[%s2233_s7 + $0x334] ss:$8 sps:$4 sm:$0xff]   ;;  %v1776_v29 = vld [vmem:[%s2233_s7 + $0x230] ss:$8 sps:$4 sm:$0xff]   ;;  %v1784_v31 = vld [vmem:[%s2233_s7 + $0x244] ss:$8 sps:$4 sm:$0xff]  }
  0x93   : > { %1188 = vmatprep.subr.bf16.mxu1 %v1706_v36  ;;  %v1779_v30 = vld [vmem:[%s2233_s7 + $0x330] ss:$8 sps:$4 sm:$0xff]   ;;  %v1787_v32 = vld [vmem:[%s2233_s7 + $0x344] ss:$8 sps:$4 sm:$0xff]   ;;  %v1782_v33 = vld [vmem:[%s2233_s7 + $0x240] ss:$8 sps:$4 sm:$0xff]  }
  0x94   : > { %v1785_v34 = vld [vmem:[%s2233_s7 + $0x340] ss:$8 sps:$4 sm:$0xff]   ;;  %v1790_v35 = vld [vmem:[%s2233_s7 + $0x254] ss:$8 sps:$4 sm:$0xff]   ;;  %v1812_v57 = vld [vmem:[%s2233_s7 + $0x290] ss:$8 sps:$4 sm:$0xff]  }
  0x95   : > { %1148 = vmatpush1.bf16.msra.mxu0 %v1708_v37  ;;  %v1793_v36 = vld [vmem:[%s2233_s7 + $0x354] ss:$8 sps:$4 sm:$0xff]   ;;  %v1788_v37 = vld [vmem:[%s2233_s7 + $0x250] ss:$8 sps:$4 sm:$0xff]   ;;  %v1806_v53 = vld [vmem:[%s2233_s7 + $0x280] ss:$8 sps:$4 sm:$0xff]  }
  0x96   : > { %1189 = vmatpush1.bf16.msra.mxu1 %v1709_v38  ;;  %1149 = vmatprep.subr.bf16.mxu0 %v1710_v39  ;;  %v1791_v38 = vld [vmem:[%s2233_s7 + $0x350] ss:$8 sps:$4 sm:$0xff]   ;;  %v1796_v39 = vld [vmem:[%s2233_s7 + $0x264] ss:$8 sps:$4 sm:$0xff]   ;;  %v1817_v56 = vld [vmem:[%s2233_s7 + $0x394] ss:$8 sps:$4 sm:$0xff]  }
  0x97   : > { %1190 = vmatprep.subr.bf16.mxu1 %v1712_v40  ;;  %v1799_v40 = vld [vmem:[%s2233_s7 + $0x364] ss:$8 sps:$4 sm:$0xff]   ;;  %s1966_s8 = scalar_lea.vmem %s1350_s22, 256 }
  0x98   : > { %v1820_v59 = vld [vmem:[%s2233_s7 + $0x2a4] ss:$8 sps:$4 sm:$0xff]   ;;  %p1967_p3 = scmp.ne.s32.totalorder %s1350_s22, %s1966_s8  ;;  %p1974_p13 = scmp.lt.s32.totalorder %s1966_s8, %s1966_s8 }
  0x99   : > { %1150 = vmatpush1.bf16.msra.mxu0 %v1714_v41  ;;  %v254_v41 = vld [vmem:[%s2226_s29 + $0x28] sm:$0xff] }
  0x9a   : > { %1191 = vmatpush1.bf16.msra.mxu1 %v1715_v42  ;;  %1151 = vmatprep.subr.bf16.mxu0 %v1716_v43  ;;  %v1794_v42 = vld [vmem:[%s2233_s7 + $0x260] ss:$8 sps:$4 sm:$0xff]   ;;  %v263_v43 = vpack.c.bf16 %v254_v41, %v254_v41  ;;  %v1844_v11 = vld [vmem:[%s2233_s7 + $0x2e4] ss:$8 sps:$4 sm:$0xff]   ;;  %p1968_p8 = pnand %p1967_p3, %p1623_p12  ;;  %p1975_p2 = por %p1974_p13, %p1973_p1 }
  0x9b   : > { %1192 = vmatprep.subr.bf16.mxu1 %v1718_v44  ;;  %v1797_v44 = vld [vmem:[%s2233_s7 + $0x360] ss:$8 sps:$4 sm:$0xff]   ;;  %v1847_v12 = vld [vmem:[%s2233_s7 + $0x3e4] ss:$8 sps:$4 sm:$0xff]  }
  0x9c   : > { %p1969_p0 = pneg %p1968_p8 }
  0x9d   : > { %1152 = vmatpush1.bf16.msra.mxu0 %v1720_v45  ;;  %v1802_v45 = vld [vmem:[%s2233_s7 + $0x274] ss:$8 sps:$4 sm:$0xff]  }
  0x9e   : > { %1193 = vmatpush1.bf16.msra.mxu1 %v1721_v46  ;;  %1153 = vmatprep.subr.bf16.mxu0 %v1722_v47  ;;  %v256_v46 = vld [vmem:[%s2226_s29 + $0x38] sm:$0xff]  ;;  %p1976_p6 = pnand %p1975_p2, %p1969_p0 }
  0x9f   : > { %1194 = vmatprep.subr.bf16.mxu1 %v1724_v48  ;;  %v1805_v47 = vld [vmem:[%s2233_s7 + $0x374] ss:$8 sps:$4 sm:$0xff]   ;;  %v265_v48 = vpack.c.bf16 %v256_v46, %v256_v46 }
  0xa1   : > { %1154 = vmatpush1.bf16.msra.mxu0 %v1726_v49  ;;  %v1800_v49 = vld [vmem:[%s2233_s7 + $0x270] ss:$8 sps:$4 sm:$0xff]  }
  0xa2   : > { %1195 = vmatpush1.bf16.msra.mxu1 %v1727_v50  ;;  %1155 = vmatprep.subr.bf16.mxu0 %v1728_v51  ;;  %v1803_v50 = vld [vmem:[%s2233_s7 + $0x370] ss:$8 sps:$4 sm:$0xff]   ;;  %v1808_v51 = vld [vmem:[%s2233_s7 + $0x284] ss:$8 sps:$4 sm:$0xff]  }
  0xa3   : > { %1196 = vmatprep.subr.bf16.mxu1 %v1730_v52  ;;  %v1811_v52 = vld [vmem:[%s2233_s7 + $0x384] ss:$8 sps:$4 sm:$0xff]  }
  0xa5   : > { %1156 = vmatpush1.bf16.msra.mxu0 %v1732_v54  ;;  %v1809_v54 = vld [vmem:[%s2233_s7 + $0x380] ss:$8 sps:$4 sm:$0xff]  }
  0xa6   : > { %1197 = vmatpush1.bf16.msra.mxu1 %v1733_v55  ;;  %1157 = vmatprep.subr.bf16.mxu0 %v1734_v58  ;;  %v1814_v55 = vld [vmem:[%s2233_s7 + $0x294] ss:$8 sps:$4 sm:$0xff]   ;;  %v1815_v58 = vld [vmem:[%s2233_s7 + $0x390] ss:$8 sps:$4 sm:$0xff]  }
  0xa7   : > { %1198 = vmatprep.subr.bf16.mxu1 %v1736_v60  ;;  %v1823_v60 = vld [vmem:[%s2233_s7 + $0x3a4] ss:$8 sps:$4 sm:$0xff]  }
  0xa9   : > { %1158 = vmatpush1.bf16.msra.mxu0 %v1738_v61  ;;  %v1818_v61 = vld [vmem:[%s2233_s7 + $0x2a0] ss:$8 sps:$4 sm:$0xff]  }
  0xaa   : > { %1199 = vmatpush1.bf16.msra.mxu1 %v1739_v62  ;;  %1159 = vmatprep.subr.bf16.mxu0 %v1740_v63  ;;  %v1821_v62 = vld [vmem:[%s2233_s7 + $0x3a0] ss:$8 sps:$4 sm:$0xff]   ;;  %v1826_v63 = vld [vmem:[%s2233_s7 + $0x2b4] ss:$8 sps:$4 sm:$0xff]  }
  0xab   : > { %1200 = vmatprep.subr.bf16.mxu1 %v1742_v0  ;;  %v1829_v0 = vld [vmem:[%s2233_s7 + $0x3b4] ss:$8 sps:$4 sm:$0xff]  }
  0xad   : > { %1160 = vmatpush1.bf16.msra.mxu0 %v1744_v1  ;;  %v1824_v1 = vld [vmem:[%s2233_s7 + $0x2b0] ss:$8 sps:$4 sm:$0xff]  }
  0xae   : > { %1201 = vmatpush1.bf16.msra.mxu1 %v1745_v2  ;;  %1161 = vmatprep.subr.bf16.mxu0 %v1746_v3  ;;  %v1827_v2 = vld [vmem:[%s2233_s7 + $0x3b0] ss:$8 sps:$4 sm:$0xff]   ;;  %v1832_v3 = vld [vmem:[%s2233_s7 + $0x2c4] ss:$8 sps:$4 sm:$0xff]  }
  0xaf   : > { %1202 = vmatprep.subr.bf16.mxu1 %v1748_v4  ;;  %v1835_v4 = vld [vmem:[%s2233_s7 + $0x3c4] ss:$8 sps:$4 sm:$0xff]  }
  0xb1   : > { %1162 = vmatpush1.bf16.msra.mxu0 %v1750_v5  ;;  %v1830_v5 = vld [vmem:[%s2233_s7 + $0x2c0] ss:$8 sps:$4 sm:$0xff]  }
  0xb2   : > { %1203 = vmatpush1.bf16.msra.mxu1 %v1751_v6  ;;  %1163 = vmatprep.subr.bf16.mxu0 %v1752_v7  ;;  %v1833_v6 = vld [vmem:[%s2233_s7 + $0x3c0] ss:$8 sps:$4 sm:$0xff]   ;;  %v1838_v7 = vld [vmem:[%s2233_s7 + $0x2d4] ss:$8 sps:$4 sm:$0xff]  }
  0xb3   : > { %1204 = vmatprep.subr.bf16.mxu1 %v1754_v8  ;;  %v1841_v8 = vld [vmem:[%s2233_s7 + $0x3d4] ss:$8 sps:$4 sm:$0xff]  }
  0xb5   : > { %1164 = vmatpush1.bf16.msra.mxu0 %v1756_v9  ;;  %v1836_v9 = vld [vmem:[%s2233_s7 + $0x2d0] ss:$8 sps:$4 sm:$0xff]  }
  0xb6   : > { %1205 = vmatpush1.bf16.msra.mxu1 %v1757_v10  ;;  %1215 = vmatprep.subr.bf16.mxu0 %v1760_v13  ;;  %v1839_v10 = vld [vmem:[%s2233_s7 + $0x3d0] ss:$8 sps:$4 sm:$0xff]   ;;  %v1842_v13 = vld [vmem:[%s2233_s7 + $0x2e0] ss:$8 sps:$4 sm:$0xff]  }
  0xb7   : > { %1256 = vmatprep.subr.bf16.mxu1 %v1763_v14  ;;  %v1845_v14 = vld [vmem:[%s2233_s7 + $0x3e0] ss:$8 sps:$4 sm:$0xff]  }
  0xb8   : > { %1166 = vmatmul.mubr.bf16.vlgmr.msra.gmra.mrb[0].mxu0 %v258_v15  ;;  %v1850_v15 = vld [vmem:[%s2233_s7 + $0x2f4] ss:$8 sps:$4 sm:$0xff]  }
  0xb9   : > { %1207 = vmatmul.mubr.bf16.vlgmr.msra.gmra.mrb[0].mxu1 %v260_v16  ;;  %1216 = vmatpush1.bf16.msra.mxu0 %v1758_v17  ;;  %v1853_v16 = vld [vmem:[%s2233_s7 + $0x3f4] ss:$8 sps:$4 sm:$0xff]   ;;  %v1848_v17 = vld [vmem:[%s2233_s7 + $0x2f0] ss:$8 sps:$4 sm:$0xff]  }
  0xba   : > { %1257 = vmatpush1.bf16.msra.mxu1 %v1761_v18  ;;  %1217 = vmatprep.subr.bf16.mxu0 %v1766_v19  ;;  %v1851_v18 = vld [vmem:[%s2233_s7 + $0x3f0] ss:$8 sps:$4 sm:$0xff]  }
  0xbb   : > { %1258 = vmatprep.subr.bf16.mxu1 %v1769_v20  ;;  %1247 = vmatprep.mubr.bf16.mxu0 %v263_v43  ;;  %v253_v19 = vld [vmem:[%s2226_s29 + $0x20] sm:$0xff]  ;;  %v255_v20 = vld [vmem:[%s2226_s29 + $0x30] sm:$0xff] }
  0xbc   : > { %1288 = vmatprep.mubr.bf16.mxu1 %v265_v48 }
  0xbd   : > { %1218 = vmatpush1.bf16.msra.mxu0 %v1764_v21  ;;  %v1856_v21 = vld [vmem:[%s2233_s7 + $0x404] ss:$8 sps:$4 sm:$0xff]  }
  0xbe   : > { %1259 = vmatpush1.bf16.msra.mxu1 %v1767_v22  ;;  %1219 = vmatprep.subr.bf16.mxu0 %v1772_v23  ;;  %v262_v22 = vpack.c.bf16 %v253_v19, %v253_v19  ;;  %v264_v23 = vpack.c.bf16 %v255_v20, %v255_v20 }
  0xbf   : > { %1260 = vmatprep.subr.bf16.mxu1 %v1775_v24  ;;  %v1854_v24 = vld [vmem:[%s2233_s7 + $0x400] ss:$8 sps:$4 sm:$0xff]  }
  0xc1   : > { %1220 = vmatpush1.bf16.msra.mxu0 %v1770_v25  ;;  %v1859_v25 = vld [vmem:[%s2233_s7 + $0x414] ss:$8 sps:$4 sm:$0xff]  }
  0xc2   : > { %1261 = vmatpush1.bf16.msra.mxu1 %v1773_v26  ;;  %1221 = vmatprep.subr.bf16.mxu0 %v1778_v27  ;;  %v1857_v26 = vld [vmem:[%s2233_s7 + $0x410] ss:$8 sps:$4 sm:$0xff]   ;;  %v2045_v27 = vmov 0  }
  0xc3   : > { %1262 = vmatprep.subr.bf16.mxu1 %v1781_v28  ;;  %v1862_v28 = vld [vmem:[%s2233_s7 + $0x424] ss:$8 sps:$4 sm:$0xff]  }
  0xc5   : > { %1222 = vmatpush1.bf16.msra.mxu0 %v1776_v29  ;;  %v1860_v29 = vld [vmem:[%s2233_s7 + $0x420] ss:$8 sps:$4 sm:$0xff]  }
  0xc6   : > { %1263 = vmatpush1.bf16.msra.mxu1 %v1779_v30  ;;  %1223 = vmatprep.subr.bf16.mxu0 %v1784_v31  ;;  %v1865_v30 = vld [vmem:[%s2233_s7 + $0x434] ss:$8 sps:$4 sm:$0xff]   ;;  %v1863_v31 = vld [vmem:[%s2233_s7 + $0x430] ss:$8 sps:$4 sm:$0xff]  }
  0xc7   : > { %1264 = vmatprep.subr.bf16.mxu1 %v1787_v32  ;;  %v1868_v32 = vld [vmem:[%s2233_s7 + $0x444] ss:$8 sps:$4 sm:$0xff]  }
  0xc9   : > { %1224 = vmatpush1.bf16.msra.mxu0 %v1782_v33  ;;  %v1866_v33 = vld [vmem:[%s2233_s7 + $0x440] ss:$8 sps:$4 sm:$0xff]  }
  0xca   : > { %1265 = vmatpush1.bf16.msra.mxu1 %v1785_v34  ;;  %1225 = vmatprep.subr.bf16.mxu0 %v1790_v35  ;;  %v1871_v34 = vld [vmem:[%s2233_s7 + $0x454] ss:$8 sps:$4 sm:$0xff]   ;;  %v1869_v35 = vld [vmem:[%s2233_s7 + $0x450] ss:$8 sps:$4 sm:$0xff]  }
  0xcb   : > { %1266 = vmatprep.subr.bf16.mxu1 %v1793_v36  ;;  %v1874_v36 = vld [vmem:[%s2233_s7 + $0x464] ss:$8 sps:$4 sm:$0xff]  }
  0xcd   : > { %1226 = vmatpush1.bf16.msra.mxu0 %v1788_v37  ;;  %v1872_v37 = vld [vmem:[%s2233_s7 + $0x460] ss:$8 sps:$4 sm:$0xff]  }
  0xce   : > { %1267 = vmatpush1.bf16.msra.mxu1 %v1791_v38  ;;  %1227 = vmatprep.subr.bf16.mxu0 %v1796_v39  ;;  %v1877_v38 = vld [vmem:[%s2233_s7 + $0x474] ss:$8 sps:$4 sm:$0xff]   ;;  %v1875_v39 = vld [vmem:[%s2233_s7 + $0x470] ss:$8 sps:$4 sm:$0xff]  }
  0xcf   : > { %1268 = vmatprep.subr.bf16.mxu1 %v1799_v40  ;;  %v257_v40 = vld [vmem:[%s2226_s29 + $0x40] sm:$0xff] }
  0xd0   : > { %v266_v41 = vpack.c.bf16 %v257_v40, %v257_v40 }
  0xd1   : > { %1228 = vmatpush1.bf16.msra.mxu0 %v1794_v42 }
  0xd2   : > { %1269 = vmatpush1.bf16.msra.mxu1 %v1797_v44  ;;  %1229 = vmatprep.subr.bf16.mxu0 %v1802_v45 }
  0xd3   : > { %1270 = vmatprep.subr.bf16.mxu1 %v1805_v47 }
  0xd5   : > { %1230 = vmatpush1.bf16.msra.mxu0 %v1800_v49 }
  0xd6   : > { %1271 = vmatpush1.bf16.msra.mxu1 %v1803_v50  ;;  %1231 = vmatprep.subr.bf16.mxu0 %v1808_v51 }
  0xd7   : > { %1272 = vmatprep.subr.bf16.mxu1 %v1811_v52 }
  0xd9   : > { %1232 = vmatpush1.bf16.msra.mxu0 %v1806_v53 }
  0xda   : > { %1273 = vmatpush1.bf16.msra.mxu1 %v1809_v54  ;;  %1233 = vmatprep.subr.bf16.mxu0 %v1814_v55 }
  0xdb   : > { %1274 = vmatprep.subr.bf16.mxu1 %v1817_v56 }
  0xdd   : > { %1234 = vmatpush1.bf16.msra.mxu0 %v1812_v57 }
  0xde   : > { %1275 = vmatpush1.bf16.msra.mxu1 %v1815_v58  ;;  %1235 = vmatprep.subr.bf16.mxu0 %v1820_v59 }
  0xdf   : > { %1276 = vmatprep.subr.bf16.mxu1 %v1823_v60 }
  0xe1   : > { %1236 = vmatpush1.bf16.msra.mxu0 %v1818_v61 }
  0xe2   : > { %1277 = vmatpush1.bf16.msra.mxu1 %v1821_v62  ;;  %1237 = vmatprep.subr.bf16.mxu0 %v1826_v63 }
  0xe3   : > { %1278 = vmatprep.subr.bf16.mxu1 %v1829_v0  ;;  %v267_v0 = vld [vmem:[#allocation8] sm:$0xff] }
  0xe5   : > { %1238 = vmatpush1.bf16.msra.mxu0 %v1824_v1 }
  0xe6   : > { %1279 = vmatpush1.bf16.msra.mxu1 %v1827_v2  ;;  %1239 = vmatprep.subr.bf16.mxu0 %v1832_v3  ;;  %v268_v3 = vld [vmem:[#allocation8 + $0x8] sm:$0xff] }
  0xe7   : > { %1280 = vmatprep.subr.bf16.mxu1 %v1835_v4 }
  0xe9   : > { %1240 = vmatpush1.bf16.msra.mxu0 %v1830_v5 }
  0xea   : > { %1281 = vmatpush1.bf16.msra.mxu1 %v1833_v6  ;;  %1241 = vmatprep.subr.bf16.mxu0 %v1838_v7 }
  0xeb   : > { %1282 = vmatprep.subr.bf16.mxu1 %v1841_v8 }
  0xed   : > { %1242 = vmatpush1.bf16.msra.mxu0 %v1836_v9 }
  0xee   : > { %1283 = vmatpush1.bf16.msra.mxu1 %v1839_v10  ;;  %1243 = vmatprep.subr.bf16.mxu0 %v1844_v11 }
  0xef   : > { %1284 = vmatprep.subr.bf16.mxu1 %v1847_v12 }
  0xf1   : > { %1244 = vmatpush1.bf16.msra.mxu0 %v1842_v13 }
  0xf2   : > { %1285 = vmatpush1.bf16.msra.mxu1 %v1845_v14  ;;  %1245 = vmatprep.subr.bf16.mxu0 %v1850_v15 }
  0xf3   : > { %1286 = vmatprep.subr.bf16.mxu1 %v1853_v16 }
  0xf5   : > { %1246 = vmatpush1.bf16.msra.mxu0 %v1848_v17 }
  0xf6   : > { %1287 = vmatpush1.bf16.msra.mxu1 %v1851_v18  ;;  %1297 = vmatprep.subr.bf16.mxu0 %v1856_v21 }
  0xf8   : > { %1248 = vmatmul.mubr.bf16.vlgmr.msra.gmra.mrb[4].mxu0 %v262_v22 }
  0xf9   : > { %1289 = vmatmul.mubr.bf16.vlgmr.msra.gmra.mrb[4].mxu1 %v264_v23  ;;  %1298 = vmatpush1.bf16.msra.mxu0 %v1854_v24 }
  0xfa   : > { %1329 = vmatprep.mubr.bf16.mxu0 %v2045_v27  ;;  %1299 = vmatprep.subr.bf16.mxu0 %v1859_v25 }
  0xfd   : > { %1300 = vmatpush1.bf16.msra.mxu0 %v1857_v26 }
  0xfe   : > { %1301 = vmatprep.subr.bf16.mxu0 %v1862_v28 }
 0x101   : > { %1302 = vmatpush1.bf16.msra.mxu0 %v1860_v29 }
 0x102   : > { %1303 = vmatprep.subr.bf16.mxu0 %v1865_v30 }
 0x105   : > { %1304 = vmatpush1.bf16.msra.mxu0 %v1863_v31 }
 0x106   : > { %1305 = vmatprep.subr.bf16.mxu0 %v1868_v32 }
 0x109   : > { %1306 = vmatpush1.bf16.msra.mxu0 %v1866_v33 }
 0x10a   : > { %1307 = vmatprep.subr.bf16.mxu0 %v1871_v34 }
 0x10d   : > { %1308 = vmatpush1.bf16.msra.mxu0 %v1869_v35 }
 0x10e   : > { %1309 = vmatprep.subr.bf16.mxu0 %v1874_v36 }
 0x111   : > { %1310 = vmatpush1.bf16.msra.mxu0 %v1872_v37 }
 0x112   : > { %1311 = vmatprep.subr.bf16.mxu0 %v1877_v38 }
 0x115   : > { %1312 = vmatpush1.bf16.msra.mxu0 %v1875_v39 }
 0x118   : > { %1330 = vmatmul.mubr.bf16.vlgmr.msra.gmra.mrb[8].mxu0 %v266_v41 }
 0x18b   : > { %v1167_v42 = vpop.f32.mrb[0].mxu0 }
 0x18c   : > { %v1208_v43 = vpop.f32.mrb[0].mxu1  ;;  %v1169_v45 = vpop.f32.mrb[1].mxu0 }
 0x18d   : > { %v1209_v44 = vadd.f32 %v1208_v43, %v1167_v42  ;;  %v1210_v46 = vpop.f32.mrb[1].mxu1  ;;  %v1171_v48 = vpop.f32.mrb[2].mxu0 }
 0x18e   : > { %v1211_v47 = vadd.f32 %v1210_v46, %v1169_v45  ;;  %v1212_v49 = vpop.f32.mrb[2].mxu1  ;;  %v1172_v50 = vpop.f32.mrb[3].mxu0 }
 0x18f   : > { %v1213_v51 = vpop.f32.mrb[3].mxu1 }
 0x1cb   : > { %v1249_v52 = vpop.f32.mrb[4].mxu0 }
 0x1cc   : > { %v1290_v53 = vpop.f32.mrb[4].mxu1  ;;  %v1250_v54 = vadd.f32 %v1249_v52, %v1209_v44  ;;  %v1251_v55 = vpop.f32.mrb[5].mxu0 }
 0x1cd   : > { %v1292_v56 = vpop.f32.mrb[5].mxu1  ;;  %v1252_v57 = vadd.f32 %v1251_v55, %v1211_v47  ;;  %v1253_v58 = vpop.f32.mrb[6].mxu0 }
 0x1ce   : > { %v1294_v59 = vpop.f32.mrb[6].mxu1  ;;  %v1291_v60 = vadd.f32 %v1290_v53, %v1250_v54  ;;  %v1254_v61 = vpop.f32.mrb[7].mxu0 }
 0x1cf   : > { %v1295_v62 = vpop.f32.mrb[7].mxu1  ;;  %v1293_v63 = vadd.f32 %v1292_v56, %v1252_v57 }
 0x1eb   : > { %v1331_v1 = vpop.f32.mrb[8].mxu0 }
 0x1ec   : > { %v1332_v2 = vadd.f32 %v1331_v1, %v1291_v60  ;;  %v1333_v4 = vpop.f32.mrb[9].mxu0 }
 0x1ed   : > { %v1334_v5 = vadd.f32 %v1333_v4, %v1293_v63  ;;  %v1335_v6 = vpop.f32.mrb[10].mxu0 }
 0x1ee   : > { %v1338_v7 = vadd.f32 %v1332_v2, %v267_v0  ;;  %v1336_v8 = vpop.f32.mrb[11].mxu0 }
 0x1ef   : > { %v1339_v9 = vadd.f32 %v1334_v5, %v268_v3 }
 0x1f0   : > { %1340 = vst [vmem:[#allocation8] sm:$0xff] %v1338_v7 }
 0x1f1   : > { %1341 = vst [vmem:[#allocation8 + $0x8] sm:$0xff] %v1339_v9 }
 0x1f2   : > { %1979 = shalt.err (!%p1976_p6)
}
 0x1f3   : > { %s1980_s15 = scalar_lea.hbm %s2437_s3, 256 }
 0x1f4   : > { %p1981_p9 = scmp.ne.s32.totalorder %s2437_s3, %s1980_s15  ;;  %p1986_p4 = scmp.lt.u32.totalorder %s1980_s15, %s2437_s3 }
 0x1f6   : > { %p1982_p7 = pnand %p1981_p9, %p1623_p12 }
 0x1f8   : > { %p1983_p5 = pneg %p1982_p7 }
 0x1fa   : > { %p1988_p10 = pnand %p1986_p4, %p1983_p5 }
 0x1fc   : > { %1991 = shalt.err (!%p1988_p10)
}
 0x1fd   : > { %1606 = dma.vmem_to_hbm [thread:$0]  (%p1623_p12), %s1350_s22, 256, %s2437_s3, [#allocation4]  }
 0x1fe   : > { %2021 = dma.done.wait (%p1623_p12), [#allocation4], 256  }
 0x1ff   : > { %2023 = vsyncadd (%p1623_p12), [#allocation4], 4294967040 }
 0x200 PF: > { %p17_p11 = scmp.ge.s32.totalorder %s2089_s17, 4   ;;  %s2452_s12 = smov %s2030_s13 }
 0x201   : > { %s2453_s13 = smov %s2034_s14  ;;  %s2454_s14 = smov %s2099_s20 }
 0x202   : > { %s2455_s15 = smov %s2089_s17  ;;  %19 = sbr.rel (!%p17_p11) target bundleno = 6 (0x6), region = 90 }
 0x209   :  { %1362 = vsyncpa [#allocation3], 1 }
 0x20a   :  { %1364 = vsyncpa [#allocation3 + $0x1], 1 }
 0x20b   :  { %1365 = vsyncpa [#allocation6], 1 }
 0x20c   :  { %1367 = vsyncpa [#allocation6 + $0x1], 1 }
 0x20d   :  { %1368 = vsyncpa [#allocation4], 1 }
 0x20e   :  { %1370 = vsyncpa [#allocation4 + $0x1], 1 }

</bundles_post_ra>
